<compile_context>
chip_gen: v5e
topology: v5e:2x2
jax: 0.10.0
libtpu: 0.0.40
codegen_flags: <defaults>
</compile_context>

<pallas_src>
import functools

import jax
import jax.numpy as jnp
from jax.experimental import pallas as pl
from jax.experimental.pallas import tpu as pltpu

_NC = 2                          # leading "cores" grid axis (megacore on v7x)
_LANES = 128
_VMEM_LIMIT = 48 * 1024 * 1024   # explicit scoped-VMEM budget (safe on v5e/v6e/v7x)


def _round_up(v, m):
    return ((v + m - 1) // m) * m


# ----------------------------------------------------------------------------
# Packed kernel: C divides 128 and C >= 8.  preds come in as (R, 128) with
# L = 128//C original rows packed per 128-lane row.
# ----------------------------------------------------------------------------
def _msfe_packed_kernel(preds_ref, target_ref, out_ref, *, others_idx, batch,
                        L, C, tiles_per_core, tr, need_mask):
    # preds_ref : (TR, 128)   packed logits (native dtype)
    # target_ref: (L, TR)     int32 targets, [l, pr] = target[pr*L + l]
    # out_ref   : (3, L, TR)  f32 per-core accumulators (fne, fne_cnt, fpe),
    #                         resident across the "arbitrary" tile axis.
    c = pl.program_id(0)
    j = pl.program_id(1)

    @pl.when(j == 0)
    def _init():
        out_ref[...] = jnp.zeros_like(out_ref)

    x = preds_ref[...].astype(jnp.float32)          # (TR, 128) lane-dense
    xt = jnp.transpose(x)                           # (128, TR) native transpose
    xt3 = xt.reshape(L, C, tr)                      # plane l = row slot l (cheap split)
    x_o = xt3[:, others_idx:others_idx + 1, :]      # (L, 1, TR)

    # Softmax shifted by the "others" logit: the o-term of the denominator is
    # exactly 1, so denom >= 1 (no 0/0) and overflow to inf correctly rounds
    # p_o to 0.  p_o == softmax(preds)[:, others_idx] up to f32 rounding.
    e = jnp.exp(xt3 - x_o)                          # dense EUP
    denom = jnp.sum(e, axis=1)                      # (L, TR) sublane reduce
    p_o = 1.0 / denom                               # (L, TR) in [0, 1]

    tgt = target_ref[...]                           # (L, TR) int32
    is_other = tgt == others_idx
    is_fpe = jnp.logical_not(is_other)

    if need_mask:
        # Mask rows beyond the logical batch (padding / ragged / clamped tile).
        g = c * tiles_per_core + j                  # unclamped global tile id
        pr = jax.lax.broadcasted_iota(jnp.int32, (L, tr), 1)
        sl = jax.lax.broadcasted_iota(jnp.int32, (L, tr), 0)
        rows = (g * tr + pr) * L + sl               # original row index
        valid = rows < batch
        is_other = jnp.logical_and(is_other, valid)
        is_fpe = jnp.logical_and(is_fpe, valid)

    zero = jnp.zeros_like(p_o)
    d = p_o - 1.0
    # fne_term = 0.5*((sum(p)-p_o)^2 + (p_o-1)^2) == (p_o-1)^2 (sum(p) == 1)
    # fpe_term = 0.5*((-p_o)^2 + p_o^2)          == p_o^2
    out_ref[0] = out_ref[0] + jnp.where(is_other, d * d, zero)
    out_ref[1] = out_ref[1] + jnp.where(is_other, jnp.ones_like(p_o), zero)
    out_ref[2] = out_ref[2] + jnp.where(is_fpe, p_o * p_o, zero)


def _msfe_loss_packed(preds, target_i, others_idx):
    B, C = preds.shape
    L = _LANES // C

    # Pad the batch so it reshapes into whole 128-lane packed rows, and so the
    # packed-row count R is at least 128 (keeps the in-kernel transpose on
    # native (mult-of-8, mult-of-128) shapes).  Padding only copies for
    # non-aligned / tiny batches; large aligned batches go through untouched.
    B_pad = _round_up(B, L)
    R = B_pad // L
    if R < _LANES:
        R = _LANES
        B_pad = R * L
    if B_pad != B:
        preds = jnp.pad(preds, ((0, B_pad - B), (0, 0)))
        target_i = jnp.pad(target_i, (0, B_pad - B))

    preds_p = preds.reshape(R, L * C)                     # free reshape
    target_t = jnp.transpose(target_i.reshape(R, L))      # (L, R), tiny copy

    # Tile size by bytes: up to ~4 MiB of f32 preds per buffer (TR <= 8192
    # packed rows), rounded to 128 lanes, and small enough that both cores
    # get work.  Total in-flight VMEM stays well under the 48 MiB limit.
    tr = min(8192, max(_LANES, _round_up(pl.cdiv(R, _NC), _LANES)))
    t_total = pl.cdiv(R, tr)
    tiles_per_core = pl.cdiv(t_total, _NC)
    need_mask = (B_pad != B) or (R % tr != 0) or (t_total != _NC * tiles_per_core)

    def pred_map(c, j):
        return (jnp.minimum(c * tiles_per_core + j, t_total - 1), 0)

    def tgt_map(c, j):
        return (0, jnp.minimum(c * tiles_per_core + j, t_total - 1))

    kernel = functools.partial(
        _msfe_packed_kernel, others_idx=int(others_idx), batch=int(B),
        L=L, C=C, tiles_per_core=tiles_per_core, tr=tr, need_mask=need_mask)

    parts = pl.pallas_call(
        kernel,
        out_shape=jax.ShapeDtypeStruct((_NC, 3, L, tr), jnp.float32),
        grid=(_NC, tiles_per_core),
        in_specs=[
            pl.BlockSpec((tr, L * C), pred_map),
            pl.BlockSpec((L, tr), tgt_map),
        ],
        out_specs=pl.BlockSpec((None, 3, L, tr), lambda c, j: (c, 0, 0, 0)),
        compiler_params=pltpu.CompilerParams(
            dimension_semantics=("parallel", "arbitrary"),
            vmem_limit_bytes=_VMEM_LIMIT),
    )(preds_p, target_t)

    # Finalize on a handful of scalars in the wrapper (per-core partials).
    fne = jnp.sum(parts[:, 0])
    fne_num = jnp.sum(parts[:, 1])
    fpe = jnp.sum(parts[:, 2])
    fpe_num = jnp.float32(B) - fne_num
    return (fpe / fpe_num) ** 2 + (fne / fne_num) ** 2


# ----------------------------------------------------------------------------
# Generic fallback kernel (any C): batch-tiled, SMEM scalar accumulators.
# ----------------------------------------------------------------------------
def _msfe_fallback_kernel(preds_ref, target_ref, out_ref, acc_ref, *,
                          others_idx, batch_size):
    i = pl.program_id(0)
    tb = target_ref.shape[0]

    @pl.when(i == 0)
    def _init():
        acc_ref[0] = 0.0   # fne
        acc_ref[1] = 0.0   # fne_num
        acc_ref[2] = 0.0   # fpe

    logits = preds_ref[...].astype(jnp.float32)                  # (TB, C)
    shifted = logits - logits[:, others_idx:others_idx + 1]
    e = jnp.exp(shifted)                                         # o-term == 1
    denom = jnp.sum(e, axis=1, keepdims=True)                    # (TB, 1), >= 1
    p_o = 1.0 / denom                                            # (TB, 1)

    row_ids = jax.lax.broadcasted_iota(jnp.int32, (tb, 1), 0) + i * tb
    valid = row_ids < batch_size
    tgt = target_ref[...]
    is_other = (tgt == others_idx) & valid
    is_fpe = (tgt != others_idx) & valid

    zeros = jnp.zeros_like(p_o)
    d = p_o - 1.0
    acc_ref[0] = acc_ref[0] + jnp.sum(jnp.where(is_other, d * d, zeros))
    acc_ref[1] = acc_ref[1] + jnp.sum(jnp.where(is_other, jnp.ones_like(p_o), zeros))
    acc_ref[2] = acc_ref[2] + jnp.sum(jnp.where(is_fpe, p_o * p_o, zeros))

    @pl.when(i == pl.num_programs(0) - 1)
    def _finalize():
        fne = acc_ref[0] / acc_ref[1]
        fpe = acc_ref[2] / (batch_size - acc_ref[1])
        out_ref[0, 0] = fpe * fpe + fne * fne


def _msfe_loss_fallback(preds, target_i, others_idx):
    B, C = preds.shape
    target2d = target_i.reshape(B, 1)

    # Tile size by bytes (~4 MiB per preds buffer), multiple of 8 rows.
    row_bytes = C * preds.dtype.itemsize
    cap = max(8, (4 * 1024 * 1024 // max(1, row_bytes)) // 8 * 8)
    TB = min(cap, (B // 8) * 8) if B >= 8 else B
    grid = (pl.cdiv(B, TB),)

    kernel = functools.partial(
        _msfe_fallback_kernel, others_idx=int(others_idx), batch_size=int(B))

    out = pl.pallas_call(
        kernel,
        out_shape=jax.ShapeDtypeStruct((1, 1), jnp.float32),
        grid=grid,
        in_specs=[
            pl.BlockSpec((TB, C), lambda i: (i, 0)),
            pl.BlockSpec((TB, 1), lambda i: (i, 0)),
        ],
        out_specs=pl.BlockSpec(memory_space=pltpu.SMEM),
        scratch_shapes=[pltpu.SMEM((3,), jnp.float32)],
        compiler_params=pltpu.CompilerParams(
            dimension_semantics=("arbitrary",),
            vmem_limit_bytes=_VMEM_LIMIT),
    )(preds, target2d)
    return out[0, 0]


# ----------------------------------------------------------------------------
# Public entry point
# ----------------------------------------------------------------------------
def msfe_loss(preds, target, others_idx):
    """preds: (B, C) float (any dtype), target: (B,) int labels.  Scalar f32."""
    B, C = preds.shape
    others_idx = int(others_idx)
    if not 0 <= others_idx < C:
        raise ValueError(f"others_idx={others_idx} out of range for C={C}")
    target_i = target.astype(jnp.int32)
    if C in (8, 16, 32, 64, 128):        # lane-packed fast path
        return _msfe_loss_packed(preds, target_i, others_idx)
    return _msfe_loss_fallback(preds, target_i, others_idx)


def _msfe_loss_ref(preds, target, others_idx):
    """Pure-JAX reference mirroring the PyTorch loop exactly."""
    p = jax.nn.softmax(preds.astype(jnp.float32), axis=1)
    p_o = p[:, others_idx]
    row_sum = jnp.sum(p, axis=1)
    fne_term = 0.5 * ((row_sum - p_o) ** 2 + (p_o - 1.0) ** 2)
    fpe_term = 0.5 * ((-p_o) ** 2 + p_o ** 2)
    is_other = target == others_idx
    fne = jnp.sum(jnp.where(is_other, fne_term, 0.0))
    fne_num = jnp.sum(is_other.astype(jnp.float32))
    fpe = jnp.sum(jnp.where(is_other, 0.0, fpe_term))
    fpe_num = jnp.sum((~is_other).astype(jnp.float32))
    return (fpe / fpe_num) ** 2 + (fne / fne_num) ** 2


if __name__ == "__main__":
    key = jax.random.PRNGKey(0)
    configs = [
        (2000, 16, 3),   # packed path: both cores active, ragged last tile
        (100, 16, 0),    # packed path: batch padded up to 128 packed rows
        (37, 10, 7),     # generic fallback path (C does not divide 128)
    ]
    for (B, C, oidx) in configs:
        key, k_preds, k_tgt = jax.random.split(key, 3)
        preds = jax.random.normal(k_preds, (B, C), dtype=jnp.float32)
        target = jax.random.randint(k_tgt, (B,), 0, C, dtype=jnp.int32)
        # Ensure both branches are non-empty (PyTorch would divide by 0 otherwise).
        target = target.at[0].set(oidx)
        target = target.at[1].set((oidx + 1) % C)

        loss = jax.block_until_ready(msfe_loss(preds, target, oidx))
        ref = _msfe_loss_ref(preds, target, oidx)
        assert jnp.allclose(loss, ref, rtol=1e-5, atol=1e-5), (B, C, oidx, loss, ref)

    print("KERNEL_OK")
</pallas_src>

<mosaic_0001>
module attributes {stable_mosaic.version = 11 : i64} {
  func.func @_msfe_packed_kernel(%arg0: i32, %arg1: i32, %arg2: memref<128x128xf32, #tpu.memory_space<vmem>>, %arg3: memref<8x128xi32, #tpu.memory_space<vmem>>, %arg4: memref<1x3x8x128xf32, #tpu.memory_space<vmem>>) attributes {dimension_semantics = [#tpu.dimension_semantics<parallel>, #tpu.dimension_semantics<arbitrary>], iteration_bounds = array<i64: 2, 1>, scalar_prefetch = 0 : i64, scratch_operands = 0 : i64, tpu.core_type = #tpu.core_type<tc>, window_params = [{transform_indices = @transform_0, window_bounds = array<i64: 128, 128>}, {transform_indices = @transform_1, window_bounds = array<i64: 8, 128>}, {transform_indices = @transform_2, window_bounds = array<i64: 1, 3, 8, 128>}]} {
    %c0_i32 = arith.constant 0 : i32
    %0 = arith.cmpi eq, %arg1, %c0_i32 : i32
    %1 = arith.extui %0 : i1 to i32
    %c0_i32_0 = arith.constant 0 : i32
    %2 = arith.cmpi ne, %1, %c0_i32_0 : i32
    scf.if %2 {
      %cst_31 = arith.constant 0.000000e+00 : f32
      %58 = vector.broadcast %cst_31 : f32 to vector<3x8x128xf32>
      %c0_32 = arith.constant 0 : index
      %c0_33 = arith.constant 0 : index
      %c0_34 = arith.constant 0 : index
      %c0_35 = arith.constant 0 : index
      %59 = vector.load %arg4[%c0_32, %c0_33, %c0_34, %c0_35] : memref<1x3x8x128xf32, #tpu.memory_space<vmem>>, vector<1x3x8x128xf32>
      %60 = vector.shape_cast %59 : vector<1x3x8x128xf32> to vector<3x8x128xf32>
      %61 = vector.shape_cast %58 : vector<3x8x128xf32> to vector<1x3x8x128xf32>
      tpu.vector_store %arg4[%c0_32, %c0_33, %c0_34, %c0_35], %61 {strides = array<i32>} : memref<1x3x8x128xf32, #tpu.memory_space<vmem>>, vector<1x3x8x128xf32>,
    } else {
    }
    %c0 = arith.constant 0 : index
    %c0_1 = arith.constant 0 : index
    %3 = vector.load %arg2[%c0, %c0_1] : memref<128x128xf32, #tpu.memory_space<vmem>>, vector<128x128xf32>
    %4 = tpu.transpose %3, [1, 0] : vector<128x128xf32> -> vector<128x128xf32>
    %5 = vector.shape_cast %4 : vector<128x128xf32> to vector<8x16x128xf32>
    %6 = vector.extract_strided_slice %5 {offsets = [0, 3, 0], sizes = [8, 1, 128], strides = [1, 1, 1]} : vector<8x16x128xf32> to vector<8x1x128xf32>
    %7 = vector.broadcast %6 : vector<8x1x128xf32> to vector<8x16x128xf32>
    %8 = arith.subf %5, %7 : vector<8x16x128xf32>
    %9 = math.exp %8 : vector<8x16x128xf32>
    %cst = arith.constant dense<0.000000e+00> : vector<8x128xf32>
    %10 = vector.multi_reduction <add>, %9, %cst [1] : vector<8x16x128xf32> to vector<8x128xf32>
    %cst_2 = arith.constant 1.000000e+00 : f32
    %11 = vector.broadcast %cst_2 : f32 to vector<8x128xf32>
    %12 = arith.divf %11, %10 : vector<8x128xf32>
    %c0_3 = arith.constant 0 : index
    %c0_4 = arith.constant 0 : index
    %13 = vector.load %arg3[%c0_3, %c0_4] : memref<8x128xi32, #tpu.memory_space<vmem>>, vector<8x128xi32>
    %c3_i32 = arith.constant 3 : i32
    %14 = vector.broadcast %c3_i32 : i32 to vector<8x128xi32>
    %15 = arith.cmpi eq, %13, %14 : vector<8x128xi32>
    %cst_5 = arith.constant dense<true> : vector<8x128xi1>
    %16 = arith.xori %15, %cst_5 : vector<8x128xi1>
    %c1_i32 = arith.constant 1 : i32
    %17 = arith.muli %arg0, %c1_i32 : i32
    %18 = arith.addi %17, %arg1 : i32
    %19 = tpu.iota {dimensions = array<i32: 1>} : vector<8x128xi32>
    %20 = tpu.iota {dimensions = array<i32: 0>} : vector<8x128xi32>
    %c128_i32 = arith.constant 128 : i32
    %21 = arith.muli %18, %c128_i32 : i32
    %22 = vector.broadcast %21 : i32 to vector<8x128xi32>
    %23 = arith.addi %22, %19 : vector<8x128xi32>
    %c8_i32 = arith.constant 8 : i32
    %24 = vector.broadcast %c8_i32 : i32 to vector<8x128xi32>
    %25 = arith.muli %23, %24 : vector<8x128xi32>
    %26 = arith.addi %25, %20 : vector<8x128xi32>
    %c2000_i32 = arith.constant 2000 : i32
    %27 = vector.broadcast %c2000_i32 : i32 to vector<8x128xi32>
    %28 = arith.cmpi slt, %26, %27 : vector<8x128xi32>
    %29 = arith.andi %15, %28 : vector<8x128xi1>
    %30 = arith.andi %16, %28 : vector<8x128xi1>
    %cst_6 = arith.constant 0.000000e+00 : f32
    %31 = vector.broadcast %cst_6 : f32 to vector<8x128xf32>
    %cst_7 = arith.constant 1.000000e+00 : f32
    %32 = vector.broadcast %cst_7 : f32 to vector<8x128xf32>
    %33 = arith.subf %12, %32 : vector<8x128xf32>
    %c0_8 = arith.constant 0 : index
    %c0_9 = arith.constant 0 : index
    %c0_10 = arith.constant 0 : index
    %c0_11 = arith.constant 0 : index
    %34 = vector.load %arg4[%c0_8, %c0_9, %c0_10, %c0_11] : memref<1x3x8x128xf32, #tpu.memory_space<vmem>>, vector<1x1x8x128xf32>
    %35 = vector.shape_cast %34 : vector<1x1x8x128xf32> to vector<8x128xf32>
    %36 = arith.mulf %33, %33 : vector<8x128xf32>
    %37 = arith.select %29, %36, %31 : vector<8x128xi1>, vector<8x128xf32>
    %38 = arith.addf %35, %37 : vector<8x128xf32>
    %c0_12 = arith.constant 0 : index
    %c0_13 = arith.constant 0 : index
    %c0_14 = arith.constant 0 : index
    %c0_15 = arith.constant 0 : index
    %39 = vector.load %arg4[%c0_12, %c0_13, %c0_14, %c0_15] : memref<1x3x8x128xf32, #tpu.memory_space<vmem>>, vector<1x1x8x128xf32>
    %40 = vector.shape_cast %39 : vector<1x1x8x128xf32> to vector<8x128xf32>
    %41 = vector.shape_cast %38 : vector<8x128xf32> to vector<1x1x8x128xf32>
    tpu.vector_store %arg4[%c0_12, %c0_13, %c0_14, %c0_15], %41 {strides = array<i32>} : memref<1x3x8x128xf32, #tpu.memory_space<vmem>>, vector<1x1x8x128xf32>,
    %c0_16 = arith.constant 0 : index
    %c1 = arith.constant 1 : index
    %c0_17 = arith.constant 0 : index
    %c0_18 = arith.constant 0 : index
    %42 = vector.load %arg4[%c0_16, %c1, %c0_17, %c0_18] : memref<1x3x8x128xf32, #tpu.memory_space<vmem>>, vector<1x1x8x128xf32>
    %43 = vector.shape_cast %42 : vector<1x1x8x128xf32> to vector<8x128xf32>
    %cst_19 = arith.constant 1.000000e+00 : f32
    %44 = vector.broadcast %cst_19 : f32 to vector<8x128xf32>
    %45 = arith.select %29, %44, %31 : vector<8x128xi1>, vector<8x128xf32>
    %46 = arith.addf %43, %45 : vector<8x128xf32>
    %c0_20 = arith.constant 0 : index
    %c1_21 = arith.constant 1 : index
    %c0_22 = arith.constant 0 : index
    %c0_23 = arith.constant 0 : index
    %47 = vector.load %arg4[%c0_20, %c1_21, %c0_22, %c0_23] : memref<1x3x8x128xf32, #tpu.memory_space<vmem>>, vector<1x1x8x128xf32>
    %48 = vector.shape_cast %47 : vector<1x1x8x128xf32> to vector<8x128xf32>
    %49 = vector.shape_cast %46 : vector<8x128xf32> to vector<1x1x8x128xf32>
    tpu.vector_store %arg4[%c0_20, %c1_21, %c0_22, %c0_23], %49 {strides = array<i32>} : memref<1x3x8x128xf32, #tpu.memory_space<vmem>>, vector<1x1x8x128xf32>,
    %c0_24 = arith.constant 0 : index
    %c2 = arith.constant 2 : index
    %c0_25 = arith.constant 0 : index
    %c0_26 = arith.constant 0 : index
    %50 = vector.load %arg4[%c0_24, %c2, %c0_25, %c0_26] : memref<1x3x8x128xf32, #tpu.memory_space<vmem>>, vector<1x1x8x128xf32>
    %51 = vector.shape_cast %50 : vector<1x1x8x128xf32> to vector<8x128xf32>
    %52 = arith.mulf %12, %12 : vector<8x128xf32>
    %53 = arith.select %30, %52, %31 : vector<8x128xi1>, vector<8x128xf32>
    %54 = arith.addf %51, %53 : vector<8x128xf32>
    %c0_27 = arith.constant 0 : index
    %c2_28 = arith.constant 2 : index
    %c0_29 = arith.constant 0 : index
    %c0_30 = arith.constant 0 : index
    %55 = vector.load %arg4[%c0_27, %c2_28, %c0_29, %c0_30] : memref<1x3x8x128xf32, #tpu.memory_space<vmem>>, vector<1x1x8x128xf32>
    %56 = vector.shape_cast %55 : vector<1x1x8x128xf32> to vector<8x128xf32>
    %57 = vector.shape_cast %54 : vector<8x128xf32> to vector<1x1x8x128xf32>
    tpu.vector_store %arg4[%c0_27, %c2_28, %c0_29, %c0_30], %57 {strides = array<i32>} : memref<1x3x8x128xf32, #tpu.memory_space<vmem>>, vector<1x1x8x128xf32>,
    return
  }
  func.func @transform_0(%arg0: i32, %arg1: i32) -> (i32, i32) {
    %c1_i32 = arith.constant 1 : i32
    %0 = arith.muli %arg0, %c1_i32 : i32
    %1 = arith.addi %0, %arg1 : i32
    %c1_i32_0 = arith.constant 1 : i32
    %2 = arith.minsi %1, %c1_i32_0 : i32
    %c0_i32 = arith.constant 0 : i32
    %c0_i32_1 = arith.constant 0 : i32
    return %2, %c0_i32 : i32, i32
  }
  func.func @transform_1(%arg0: i32, %arg1: i32) -> (i32, i32) {
    %c1_i32 = arith.constant 1 : i32
    %0 = arith.muli %arg0, %c1_i32 : i32
    %1 = arith.addi %0, %arg1 : i32
    %c1_i32_0 = arith.constant 1 : i32
    %2 = arith.minsi %1, %c1_i32_0 : i32
    %c0_i32 = arith.constant 0 : i32
    %c0_i32_1 = arith.constant 0 : i32
    return %c0_i32, %2 : i32, i32
  }
  func.func @transform_2(%arg0: i32, %arg1: i32) -> (i32, i32, i32, i32) {
    %c0_i32 = arith.constant 0 : i32
    %c0_i32_0 = arith.constant 0 : i32
    %c0_i32_1 = arith.constant 0 : i32
    %c0_i32_2 = arith.constant 0 : i32
    return %arg0, %c0_i32, %c0_i32_0, %c0_i32_1 : i32, i32, i32, i32
  }
}

</mosaic_0001>

<bundles_post_ra>
// kernel: tpu_custom_call.1
= control target key start
LH: loop header
LB: loop body
LE: loop exit
PB: predicated region body
PF: predicated region fallthrough
CT: control target
= control target key end

     0   :  { %s1383_s0 = inlined_call_operand.hbm [shape: f32[250,128], index: 0, kind: input, shape index: {}]   ;;  %s1384_s1 = inlined_call_operand.hbm [shape: s32[8,250], index: 1, kind: input, shape index: {}]   ;;  %s1385_s2 = inlined_call_operand.hbm [shape: f32[2,3,8,128], index: 2, kind: output, shape index: {}]  }
   0x1   :  { %1388 = sst [smem:[#allocation14_spill]] %s1383_s0 }
   0x2   :  { %7 = vsyncpa [#allocation3], 0 }
   0x3   :  { %9 = vsyncpa [#allocation3 + $0x1], 0 }
   0x4   :  { %10 = vsyncpa [#allocation6], 0 }
   0x5   :  { %12 = vsyncpa [#allocation6 + $0x1], 0 }
   0x6   :  { %13 = vsyncpa [#allocation4], 0 }
   0x7   :  { %15 = vsyncpa [#allocation4 + $0x1], 0  ;;  %s1109_s9 = smov 0   ;;  %s1111_s10 = smov 0  }
   0x8   :  { %s1113_s11 = smov 0   ;;  %s1115_s12 = smov 0  }
   0x9   :  { %s1117_s13 = smov 0   ;;  %s1119_s14 = smov 0  }
   0xa   :  { %s1121_s15 = smov 0   ;;  %s1123_s16 = smov 0  }
   0xb   :  { %s1125_s17 = smov 0  }
   0xc LB: > { %1389 = sst [smem:[#allocation11_spill]] %s1082_s16  ;;  %s740_s18 = sadd.s32 4294967295, %s1086_s17   ;;  %s1086_s17 = sphi %s1125_s17, %s21_s17   ;;  %s1082_s16 = sphi %s1123_s16, %s1406_s16   ;;  %s1078_s15 = sphi %s1121_s15, %s1405_s15   ;;  %s1074_s14 = sphi %s1119_s14, %s1412_s14   ;;  %s1070_s13 = sphi %s1117_s13, %s1411_s13   ;;  %s1066_s12 = sphi %s1115_s12, %s1410_s12   ;;  %s1062_s11 = sphi %s1113_s11, %s1409_s11   ;;  %s1058_s10 = sphi %s1111_s10, %s1408_s10   ;;  %s1054_s9 = sphi %s1109_s9, %s1407_s9  }
   0xd   : > { %s741_s19 = sadd.s32 4294967294, %s1086_s17   ;;  %s33_s20 = sadd.s32 1, %s1082_s16 }
   0xe   : > { %p38_p0 = scmp.lt.s32.totalorder %s1082_s16, 1  ;;  %p35_p1 = scmp.ge.s32.totalorder %s33_s20, 2 }
   0xf   : > { %s46_s21 = sadd.s32 1, %s1074_s14  ;;  %p53_p2 = scmp.ne.s32.totalorder %s1074_s14, %s1070_s13 }
  0x10   : > { %s1158_s22 = scalar_select %p38_p0, %s1082_s16, 1 }
  0x11   : > { %s1414_s20 = smov (%p35_p1, %s33_s20), 0  ;;  %p54_p3 = scmp.eq.s32.totalorder %s1086_s17, 0 }
  0x12   : > { %1390 = sst [smem:[#allocation12_spill]] %s1414_s20  ;;  %p41_p4 = scmp.lt.s32.totalorder %s1414_s20, 1 }
  0x13   : > { %p59_p5 = scmp.ne.s32.totalorder %s1070_s13, %s1066_s12  ;;  %p1167_p6 = por %p54_p3, %p53_p2 }
  0x14   : > { %p60_p7 = scmp.eq.s32.totalorder %s740_s18, 0  ;;  %s101_s26 = ssub.s32 %s1082_s16, %s1414_s20 }
  0x15   : > { %s42_s24 = scalar_select %p41_p4, %s1414_s20, 1 }
  0x16   : > { %p1172_p8 = por %p60_p7, %p59_p5  ;;  %p102_p9 = scmp.eq.s32.totalorder %s101_s26, 0 }
  0x17   : > { %s43_s27 = ssub.s32 %s1158_s22, %s42_s24  ;;  %s104_s28 = sadd.s32 1, %s1062_s11 }
  0x18   : > { %p44_p10 = scmp.eq.s32.totalorder %s43_s27, 0  ;;  %p114_p11 = scmp.ne.s32.totalorder %s1062_s11, %s1058_s10 }
  0x19   : > { %s1181_s29 = scalar_select %p102_p9, %s1062_s11, %s104_s28  }
  0x1a   : > { %s1184_s30 = scalar_select %p44_p10, %s1074_s14, %s46_s21  }
  0x1b   : > { %p115_p12 = scmp.eq.s32.totalorder %s740_s18, 1  ;;  %p120_p13 = scmp.ne.s32.totalorder %s1058_s10, %s1054_s9 }
  0x1c   : > { %1393 = sst [smem:[#allocation13_spill]] %s1184_s30  ;;  %p121_p0 = scmp.eq.s32.totalorder %s741_s19, 1 }
  0x1d   : > { %p1190_p1 = por %p115_p12, %p114_p11  ;;  %p743_p2 = scmp.ge.s32.totalorder %s1086_s17, 2 }
  0x1e   : > { %p1195_p3 = por %p121_p0, %p120_p13  ;;  %p788_p4 = scmp.lt.s32.totalorder %s1086_s17, 2 }
  0x1f   : > { %s141_s5 = sand.u32 1, %s1074_s14   ;;  %s768_s6 = sshll.u32 %s1158_s22, 7 }
  0x20   : > { %s744_s7 = sshll.u32 %s141_s5, 7  ;;  %s1396_s0 = sld [smem:[#allocation14_spill]] }
  0x21   : > { %s145_s21 = scalar_lea.vmem [#allocation2], %s744_s7  ;;  %p1207_p5 = pnand %p788_p4, %p1167_p6 }
  0x22   : > { %s156_s24 = sshll.u32 %s145_s21, 4  ;;  %p749_p7 = scmp.ge.s32.totalorder %s1086_s17, 1  ;;  %s157_s24 = int_to_ptr.vmem [resolvable:$true] %s156_s24 }
  0x23   : > { %p186_p9 = scmp.lt.s32.totalorder %s1086_s17, 3  ;;  %s142_s27 = scalar_lea.sflag [#allocation3], %s141_s5 }
  0x24   : > { %s1088_s28 = smov 128   ;;  %s1089_s20 = smov 8  }
  0x25   : > { %p187_p10 = pnand %p749_p7, %p186_p9  ;;  %s748_s7 = sshll.u32 %s1158_s22, 3 }
  0x26   : > { %s153_s18 = scalar_lea.hbm %s1396_s0, %s768_s6  ;;  %s747_s6 = sshll.u32 %s141_s5, 3 }
  0x27   : > { %s154_s19 = sshll.u32 %s153_s18, 4  ;;  %s177_s23 = scalar_lea.hbm %s1384_s1, %s748_s7  ;;  %s155_s19 = int_to_ptr.hbm [resolvable:$true] %s154_s19 }
  0x28   : > { %780 = dma.hbm_to_vmem [thread:$0]  (!%p1207_p5), %s155_s19, 2048, %s157_s24, %s142_s27, %s1088_s28, %s1088_s28, %s1089_s20  }
  0x29   : > { %s179_s18 = sshll.u32 %s177_s23, 4  ;;  %s170_s21 = scalar_lea.vmem [#allocation5], %s747_s6  ;;  %s180_s18 = int_to_ptr.hbm [resolvable:$true] %s179_s18 }
  0x2a   : > { %s181_s0 = sshll.u32 %s170_s21, 4  ;;  %s167_s16 = scalar_lea.sflag [#allocation6], %s141_s5  ;;  %s182_s0 = int_to_ptr.vmem [resolvable:$true] %s181_s0 }
  0x2b   : > { %783 = dma.hbm_to_vmem [thread:$0]  (!%p1207_p5), %s180_s18, 128, %s182_s0, %s167_s16  }
  0x2c   : > { %190 = sbr.rel (%p187_p10) target bundleno = 391 (0x187), region = 28  ;;  %s192_s30 = sand.u32 (!%p187_p10), 1, %s1070_s13  }
  0x2d   : > { %s750_s20 = sshll.u32 (!%p187_p10), %s192_s30, 7  ;;  %s193_s19 = scalar_lea.sflag (!%p187_p10), [#allocation3], %s192_s30 }
  0x2e   : > { %s1222_s24 = scalar_lea.vmem (!%p187_p10), [#allocation2], %s750_s20 }
  0x31   : > { %1041 = dma.done.wait (%p1172_p8), %s193_s19, 2048  }
  0x32   : > { %1043 = vsyncadd (%p1172_p8), %s193_s19, 4294965248  ;;  %s751_s22 = sshll.u32 %s192_s30, 3  ;;  %s203_s27 = scalar_lea.sflag [#allocation6], %s192_s30 }
  0x33   : > { %s1228_s28 = scalar_lea.vmem [#allocation5], %s751_s22 }
  0x34   : > { %1045 = dma.done.wait (%p1172_p8), %s203_s27, 128  }
  0x35   : > { %1047 = vsyncadd (%p1172_p8), %s203_s27, 4294967168  ;;  %v247_v0 = vld [vmem:[%s1222_s24] sm:$0xff]  ;;  %v248_v1 = vld [vmem:[%s1222_s24 + $0x8] sm:$0xff]  ;;  %vm568_vm8 = vcmask 1041409   ;;  %vm570_vm13 = vcmask 1042434   ;;  %s752_s0 = sshll.u32 %s1078_s15, 7 }
  0x36   : > { %263 = vxpose.xlu0.b32.start [1/16] %v247_v0, 128  ;;  %v249_v2 = vld [vmem:[%s1222_s24 + $0x10] sm:$0xff]  ;;  %v250_v3 = vld [vmem:[%s1222_s24 + $0x18] sm:$0xff]  ;;  %v251_v4 = vld [vmem:[%s1222_s24 + $0x20] sm:$0xff]  ;;  %s230_s16 = sand.u32 1, %s1058_s10   ;;  %s770_s5 = smul.u32 24, %s1078_s15 }
  0x37   : > { %v252_v5 = vld [vmem:[%s1222_s24 + $0x28] sm:$0xff]  ;;  %v253_v6 = vld [vmem:[%s1222_s24 + $0x30] sm:$0xff]  ;;  %v254_v7 = vld [vmem:[%s1222_s24 + $0x38] sm:$0xff]  ;;  %s769_s25 = smul.u32 24, %s230_s16  ;;  %s621_s12 = scalar_lea.sflag [#allocation4], %s230_s16 }
  0x38   : > { %v255_v8 = vld [vmem:[%s1222_s24 + $0x40] sm:$0xff]  ;;  %v256_v9 = vld [vmem:[%s1222_s24 + $0x48] sm:$0xff]  ;;  %v257_v10 = vld [vmem:[%s1222_s24 + $0x50] sm:$0xff]  ;;  %s632_s6 = scalar_lea.hbm %s1385_s2, %s770_s5  ;;  %s996_s19 = scalar_lea.hbm %s1385_s2, 48 }
  0x39   : > { %v258_v11 = vld [vmem:[%s1222_s24 + $0x58] sm:$0xff]  ;;  %v259_v12 = vld [vmem:[%s1222_s24 + $0x60] sm:$0xff]  ;;  %v260_v13 = vld [vmem:[%s1222_s24 + $0x68] sm:$0xff]  ;;  %s1290_s30 = scalar_lea.vmem [#allocation7], %s769_s25  ;;  %s635_s8 = sshll.u32 %s632_s6, 4  ;;  %s636_s8 = int_to_ptr.hbm [resolvable:$true] %s635_s8 }
  0x3a   : > { %v261_v14 = vld [vmem:[%s1222_s24 + $0x70] sm:$0xff]  ;;  %v262_v15 = vld [vmem:[%s1222_s24 + $0x78] sm:$0xff]  ;;  %s633_s7 = sshll.u32 %s1290_s30, 4  ;;  %s990_s23 = sshra.s32 %s636_s8, 4  ;;  %s634_s7 = int_to_ptr.vmem [resolvable:$true] %s633_s7  ;;  %s991_s23 = int_to_ptr.hbm [resolvable:$true] %s990_s23 }
  0x3b   : > { %s992_s18 = scalar_lea.hbm %s991_s23, 24  ;;  %p997_p12 = scmp.lt.s32.totalorder %s991_s23, %s1385_s2 }
  0x3c   : > { %p993_p6 = scmp.ne.s32.totalorder %s991_s23, %s992_s18  ;;  %p998_p13 = scmp.lt.s32.totalorder %s996_s19, %s992_s18 }
  0x3e   : > { %264 = vxpose.xlu0.b32.cont [2/16] %v248_v1, 128  ;;  %p994_p8 = pnand %p993_p6, %p1190_p1  ;;  %p999_p0 = por %p998_p13, %p997_p12 }
  0x40   : > { %p995_p11 = pneg %p994_p8 }
  0x42   : > { %p1000_p4 = pnand %p999_p0, %p995_p11 }
  0x46   : > { %265 = vxpose.xlu0.b32.cont [3/16] %v249_v2, 128 }
  0x4e   : > { %266 = vxpose.xlu0.b32.cont [4/16] %v250_v3, 128 }
  0x56   : > { %267 = vxpose.xlu0.b32.cont [5/16] %v251_v4, 128 }
  0x5e   : > { %268 = vxpose.xlu0.b32.cont [6/16] %v252_v5, 128 }
  0x66   : > { %269 = vxpose.xlu0.b32.cont [7/16] %v253_v6, 128 }
  0x6e   : > { %270 = vxpose.xlu0.b32.cont [8/16] %v254_v7, 128 }
  0x76   : > { %271 = vxpose.xlu0.b32.cont [9/16] %v255_v8, 128 }
  0x7e   : > { %272 = vxpose.xlu0.b32.cont [10/16] %v256_v9, 128 }
  0x86   : > { %273 = vxpose.xlu0.b32.cont [11/16] %v257_v10, 128 }
  0x8e   : > { %274 = vxpose.xlu0.b32.cont [12/16] %v258_v11, 128 }
  0x96   : > { %275 = vxpose.xlu0.b32.cont [13/16] %v259_v12, 128 }
  0x9e   : > { %276 = vxpose.xlu0.b32.cont [14/16] %v260_v13, 128 }
  0xa6   : > { %277 = vxpose.xlu0.b32.cont [15/16] %v261_v14, 128 }
  0xae   : > { %278 = vxpose.xlu0.b32.end [16/16] %v262_v15, 128 }
  0xda   : > { %v279_v16 = vpop.trf.xlu0 }
  0xdb   : > { %v295_v17 = vperm.slane %v279_v16, 3 }
  0xdd   : > { %v303_v18 = vsub.f32 %v279_v16, %v295_v17 }
  0xdf   : > { %v319_v19 = vmul.f32 1.442695, %v303_v18 }
  0xe1   : > { %868 = vpow2.f32 %v319_v19 }
  0xe2   : > { %v280_v20 = vpop.trf.xlu0 }
  0xe3   : > { %v304_v21 = vsub.f32 %v280_v20, %v295_v17 }
  0xe5   : > { %v321_v22 = vmul.f32 1.442695, %v304_v21 }
  0xe7   : > { %870 = vpow2.f32 %v321_v22  ;;  %v869_v25 = vpop.eup %868 }
  0xea   : > { %v281_v23 = vpop.trf.xlu0 }
  0xeb   : > { %v296_v24 = vperm.slane %v281_v23, 3 }
  0xed   : > { %v871_v26 = vpop.eup %870  ;;  %v305_v28 = vsub.f32 %v281_v23, %v296_v24 }
  0xee   : > { %v351_v27 = vadd.f32 %v871_v26, %v869_v25 }
  0xef   : > { %v323_v31 = vmul.f32 1.442695, %v305_v28 }
  0xf0   : > { %v352_v29 = vrot.slane %v351_v27, 4 }
  0xf1   : > { %872 = vpow2.f32 %v323_v31 }
  0xf2   : > { %v353_v30 = vadd.f32 %v352_v29, %v351_v27  ;;  %v282_v32 = vpop.trf.xlu0 }
  0xf3   : > { %v306_v33 = vsub.f32 %v282_v32, %v296_v24 }
  0xf4   : > { %v354_v34 = vrot.slane %v353_v30, 2 }
  0xf5   : > { %v325_v35 = vmul.f32 1.442695, %v306_v33 }
  0xf6   : > { %v355_v36 = vadd.f32 %v354_v34, %v353_v30 }
  0xf7   : > { %874 = vpow2.f32 %v325_v35  ;;  %v873_v41 = vpop.eup %872 }
  0xf8   : > { %v356_v37 = vrot.slane %v355_v36, 1 }
  0xfa   : > { %v357_v38 = vadd.f32 %v356_v37, %v355_v36  ;;  %v283_v39 = vpop.trf.xlu0 }
  0xfb   : > { %v297_v40 = vperm.slane %v283_v39, 3 }
  0xfc   : > { %876 = vrcp.f32 %v357_v38  ;;  %v416_v3 = vand.u32 2147483647, %v357_v38  ;;  %v418_v5 = vand.u32 2147483648, %v357_v38  ;;  %vm412_vm1 = vweird.f32 %v357_v38 }
  0xfd   : > { %v875_v42 = vpop.eup %874  ;;  %v307_v44 = vsub.f32 %v283_v39, %v297_v40 }
  0xfe   : > { %v358_v43 = vadd.f32 %v875_v42, %v873_v41  ;;  %vm417_vm3 = vcmp.eq.f32.partialorder %v416_v3, 8.507059e+37  ;;  %v419_v15 = vor.u32 1.1754944e-38, %v418_v5 }
  0xff   : > { %v327_v48 = vmul.f32 1.442695, %v307_v44 }
 0x100   : > { %v359_v45 = vrot.slane %v358_v43, 4 }
 0x101   : > { %878 = vpow2.f32 %v327_v48 }
 0x102   : > { %v877_v46 = vpop.eup %876  ;;  %v360_v47 = vadd.f32 %v359_v45, %v358_v43  ;;  %v284_v49 = vpop.trf.xlu0 }
 0x103   : > { %v308_v50 = vsub.f32 %v284_v49, %v297_v40  ;;  %v408_v52 = vmul.f32 %v877_v46, %v357_v38  ;;  %vm413_vm0 = vweird.f32 %v877_v46 }
 0x104   : > { %v361_v51 = vrot.slane %v360_v47, 2  ;;  %vm414_vm2 = vmor %vm412_vm1, %vm413_vm0 }
 0x105   : > { %v329_v53 = vmul.f32 1.442695, %v308_v50  ;;  %v409_v56 = vsub.f32 1.0, %v408_v52 }
 0x106   : > { %v362_v54 = vadd.f32 %v361_v51, %v360_v47 }
 0x107   : > { %880 = vpow2.f32 %v329_v53  ;;  %v879_v60 = vpop.eup %878  ;;  %v410_v62 = vmul.f32 %v877_v46, %v409_v56 }
 0x108   : > { %v363_v55 = vrot.slane %v362_v54, 1 }
 0x109   : > { %v411_v2 = vadd.f32 %v877_v46, %v410_v62 }
 0x10a   : > { %v364_v57 = vadd.f32 %v363_v55, %v362_v54  ;;  %v285_v58 = vpop.trf.xlu0 }
 0x10b   : > { %v298_v59 = vperm.slane %v285_v58, 3  ;;  %v415_v12 = vsel %vm414_vm2, %v877_v46, %v411_v2  ;;  %vm572_vm2 = vcmask 1043459  }
 0x10c   : > { %882 = vrcp.f32 %v364_v57  ;;  %v433_v16 = vand.u32 2147483648, %v364_v57  ;;  %v431_v19 = vand.u32 2147483647, %v364_v57  ;;  %v420_v20 = vsel %vm417_vm3, %v419_v15, %v415_v12 }
 0x10d   : > { %v881_v61 = vpop.eup %880  ;;  %v309_v0 = vsub.f32 %v285_v58, %v298_v59  ;;  %vm427_vm5 = vweird.f32 %v364_v57  ;;  %v753_v26 = vadd.f32 -1.0, %v420_v20  ;;  %v593_v31 = vmul.f32 %v420_v20, %v420_v20 }
 0x10e   : > { %v365_v63 = vadd.f32 %v881_v61, %v879_v60  ;;  %v434_v23 = vor.u32 1.1754944e-38, %v433_v16  ;;  %vm432_vm7 = vcmp.eq.f32.partialorder %v431_v19, 8.507059e+37 }
 0x10f   : > { %v331_v7 = vmul.f32 1.442695, %v309_v0  ;;  %v552_v35 = vmul.f32 %v753_v26, %v753_v26 }
 0x110   : > { %v366_v1 = vrot.slane %v365_v63, 4 }
 0x111   : > { %884 = vpow2.f32 %v331_v7 }
 0x112   : > { %v883_v4 = vpop.eup %882  ;;  %v367_v6 = vadd.f32 %v366_v1, %v365_v63  ;;  %v286_v8 = vpop.trf.xlu0 }
 0x113   : > { %v423_v9 = vmul.f32 %v883_v4, %v364_v57  ;;  %v310_v10 = vsub.f32 %v286_v8, %v298_v59  ;;  %vm428_vm4 = vweird.f32 %v883_v4 }
 0x114   : > { %v368_v11 = vrot.slane %v367_v6, 2  ;;  %vm429_vm6 = vmor %vm427_vm5, %vm428_vm4 }
 0x115   : > { %v424_v13 = vsub.f32 1.0, %v423_v9  ;;  %v333_v14 = vmul.f32 1.442695, %v310_v10 }
 0x116   : > { %v369_v17 = vadd.f32 %v368_v11, %v367_v6 }
 0x117   : > { %v425_v18 = vmul.f32 %v883_v4, %v424_v13  ;;  %886 = vpow2.f32 %v333_v14  ;;  %v885_v28 = vpop.eup %884 }
 0x118   : > { %v370_v21 = vrot.slane %v369_v17, 1 }
 0x119   : > { %v426_v22 = vadd.f32 %v883_v4, %v425_v18 }
 0x11a   : > { %v371_v24 = vadd.f32 %v370_v21, %v369_v17  ;;  %v287_v25 = vpop.trf.xlu0 }
 0x11b   : > { %v430_v27 = vsel %vm429_vm6, %v883_v4, %v426_v22  ;;  %v299_v48 = vperm.slane %v287_v25, 3 }
 0x11c   : > { %v435_v29 = vsel %vm432_vm7, %v434_v23, %v430_v27  ;;  %888 = vrcp.f32 %v371_v24  ;;  %v448_v46 = vand.u32 2147483648, %v371_v24  ;;  %v446_v50 = vand.u32 2147483647, %v371_v24 }
 0x11d   : > { %v887_v30 = vpop.eup %886  ;;  %v754_v32 = vadd.f32 -1.0, %v435_v29  ;;  %v594_v33 = vmul.f32 %v435_v29, %v435_v29  ;;  %vm442_vm10 = vweird.f32 %v371_v24  ;;  %v311_v56 = vsub.f32 %v287_v25, %v299_v48 }
 0x11e   : > { %v372_v34 = vadd.f32 %v887_v30, %v885_v28  ;;  %v449_v54 = vor.u32 1.1754944e-38, %v448_v46  ;;  %vm447_vm12 = vcmp.eq.f32.partialorder %v446_v50, 8.507059e+37 }
 0x11f   : > { %v553_v36 = vmul.f32 %v754_v32, %v754_v32  ;;  %v609_v37 = vsel %vm568_vm8, %v594_v33, %v593_v31  ;;  %v335_v0 = vmul.f32 1.442695, %v311_v56 }
 0x120   : > { %v373_v38 = vrot.slane %v372_v34, 4 }
 0x121   : > { %v569_v39 = vsel %vm568_vm8, %v553_v36, %v552_v35 }
 0x122   : > { %v889_v40 = vpop.eup %888  ;;  %v374_v41 = vadd.f32 %v373_v38, %v372_v34  ;;  %v288_v42 = vpop.trf.xlu0 }
 0x123   : > { %v438_v43 = vmul.f32 %v889_v40, %v371_v24  ;;  %vm443_vm9 = vweird.f32 %v889_v40  ;;  %v312_v52 = vsub.f32 %v288_v42, %v299_v48 }
 0x124   : > { %v375_v44 = vrot.slane %v374_v41, 2  ;;  %vm444_vm11 = vmor %vm442_vm10, %vm443_vm9 }
 0x125   : > { %v439_v45 = vsub.f32 1.0, %v438_v43  ;;  %v337_v61 = vmul.f32 1.442695, %v312_v52 }
 0x126   : > { %v376_v47 = vadd.f32 %v375_v44, %v374_v41 }
 0x127   : > { %v440_v49 = vmul.f32 %v889_v40, %v439_v45 }
 0x128   : > { %v377_v51 = vrot.slane %v376_v47, 1 }
 0x129   : > { %v441_v53 = vadd.f32 %v889_v40, %v440_v49 }
 0x12a   : > { %v378_v55 = vadd.f32 %v377_v51, %v376_v47  ;;  %v289_v57 = vpop.trf.xlu0 }
 0x12b   : > { %v445_v58 = vsel %vm444_vm11, %v889_v40, %v441_v53  ;;  %v300_v59 = vperm.slane %v289_v57, 3 }
 0x12c   : > { %v450_v60 = vsel %vm447_vm12, %v449_v54, %v445_v58  ;;  %890 = vrcp.f32 %v378_v55  ;;  %v463_v13 = vand.u32 2147483648, %v378_v55  ;;  %v461_v15 = vand.u32 2147483647, %v378_v55 }
 0x12d   : > { %v755_v62 = vadd.f32 -1.0, %v450_v60  ;;  %v595_v63 = vmul.f32 %v450_v60, %v450_v60  ;;  %v313_v1 = vsub.f32 %v289_v57, %v300_v59  ;;  %892 = vpow2.f32 %v337_v61 }
 0x12e   : > { %894 = vpow2.f32 %v335_v0  ;;  %vm457_vm15 = vweird.f32 %v378_v55  ;;  %v464_v19 = vor.u32 1.1754944e-38, %v463_v13  ;;  %vm462_vm1 = vcmp.eq.f32.partialorder %v461_v15, 8.507059e+37 }
 0x12f   : > { %v554_v2 = vmul.f32 %v755_v62, %v755_v62  ;;  %v610_v3 = vsel %vm570_vm13, %v595_v63, %v609_v37  ;;  %v339_v6 = vmul.f32 1.442695, %v313_v1  ;;  %v531_v62 = vlaneseq }
 0x131   : > { %v571_v4 = vsel %vm570_vm13, %v554_v2, %v569_v39  ;;  %896 = vpow2.f32 %v339_v6  ;;  %v532_v0 = vand.u32 127, %v531_v62  ;;  %v536_v2 = vstv %s752_s0 }
 0x132   : > { %v891_v5 = vpop.eup %890  ;;  %v290_v7 = vpop.trf.xlu0  ;;  %v534_v6 = vshrl.u32 %v531_v62, 7 }
 0x133   : > { %v453_v8 = vmul.f32 %v891_v5, %v378_v55  ;;  %v314_v9 = vsub.f32 %v290_v7, %v300_v59  ;;  %v893_v12 = vpop.eup %892  ;;  %vm458_vm14 = vweird.f32 %v891_v5 }
 0x134   : > { %v895_v16 = vpop.eup %894  ;;  %vm459_vm0 = vmor %vm457_vm15, %vm458_vm14 }
 0x135   : > { %v454_v10 = vsub.f32 1.0, %v453_v8  ;;  %v341_v11 = vmul.f32 1.442695, %v314_v9  ;;  %v379_v18 = vadd.f32 %v895_v16, %v893_v12 }
 0x137   : > { %v455_v14 = vmul.f32 %v891_v5, %v454_v10  ;;  %898 = vpow2.f32 %v341_v11  ;;  %v897_v23 = vpop.eup %896  ;;  %v380_v28 = vrot.slane %v379_v18, 4  ;;  %v1267_v10 = vld [vmem:[%s1228_s28] sm:$0xff] }
 0x138   : > { %vm528_vm3 = vcmp.eq.s32.totalorder %v1267_v10, 3 }
 0x139   : > { %v456_v17 = vadd.f32 %v891_v5, %v455_v14  ;;  %v381_v35 = vadd.f32 %v380_v28, %v379_v18 }
 0x13a   : > { %v291_v20 = vpop.trf.xlu0 }
 0x13b   : > { %v460_v21 = vsel %vm459_vm0, %v891_v5, %v456_v17  ;;  %v301_v22 = vperm.slane %v291_v20, 3  ;;  %v382_v40 = vrot.slane %v381_v35, 2 }
 0x13c   : > { %v465_v24 = vsel %vm462_vm1, %v464_v19, %v460_v21  ;;  %v1090_v21 = vmov 0.0  }
 0x13d   : > { %v899_v25 = vpop.eup %898  ;;  %v756_v26 = vadd.f32 -1.0, %v465_v24  ;;  %v596_v27 = vmul.f32 %v465_v24, %v465_v24  ;;  %v315_v30 = vsub.f32 %v291_v20, %v301_v22  ;;  %v383_v43 = vadd.f32 %v382_v40, %v381_v35 }
 0x13e   : > { %v386_v29 = vadd.f32 %v899_v25, %v897_v23 }
 0x13f   : > { %v555_v31 = vmul.f32 %v756_v26, %v756_v26  ;;  %v1250_v32 = vsel %vm572_vm2, %v596_v27, %v610_v3  ;;  %v343_v36 = vmul.f32 1.442695, %v315_v30  ;;  %v384_v49 = vrot.slane %v383_v43, 1 }
 0x140   : > { %v387_v33 = vrot.slane %v386_v29, 4  ;;  %v537_v3 = vadd.s32 %v536_v2, %v532_v0 }
 0x141   : > { %v1252_v34 = vsel %vm572_vm2, %v555_v31, %v571_v4  ;;  %900 = vpow2.f32 %v343_v36  ;;  %v1254_v54 = vadd.f32 %v384_v49, %v383_v43 }
 0x142   : > { %v292_v37 = vpop.trf.xlu0  ;;  %v388_v39 = vadd.f32 %v387_v33, %v386_v29  ;;  %v538_v7 = vmul.u32 8, %v537_v3 }
 0x143   : > { %v316_v38 = vsub.f32 %v292_v37, %v301_v22  ;;  %vm472_vm7 = vweird.f32 %v1254_v54  ;;  %v478_v36 = vand.u32 2147483648, %v1254_v54 }
 0x144   : > { %v389_v42 = vrot.slane %v388_v39, 2  ;;  %v1269_v11 = vadd.s32 %v538_v7, %v534_v6 }
 0x145   : > { %v345_v41 = vmul.f32 1.442695, %v316_v38  ;;  %v476_v38 = vand.u32 2147483647, %v1254_v54 }
 0x146   : > { %v390_v47 = vadd.f32 %v389_v42, %v388_v39  ;;  %vm540_vm4 = vcmp.lt.s32.totalorder %v1269_v11, 2000 }
 0x147   : > { %902 = vpow2.f32 %v345_v41  ;;  %v901_v46 = vpop.eup %900  ;;  %vm1280_vm5 = vmand %vm528_vm3, %vm540_vm4  ;;  %vm477_vm15 = vcmp.eq.f32.partialorder %v476_v38, 8.507059e+37 }
 0x148   : > { %v391_v52 = vrot.slane %v390_v47, 1  ;;  %904 = vrcp.f32 %v1254_v54  ;;  %v588_v22 = vsel %vm1280_vm5, 1.0, %v1090_v21 }
 0x149   : > { %762 = vst [vmem:[%s1290_s30 + $0x8] sm:$0xff] %v588_v22 }
 0x14a   : > { %v293_v44 = vpop.trf.xlu0  ;;  %v1256_v59 = vadd.f32 %v391_v52, %v390_v47 }
 0x14b   : > { %v302_v45 = vperm.slane %v293_v44, 3 }
 0x14c   : > { %v493_v39 = vand.u32 2147483648, %v1256_v59  ;;  %vm487_vm11 = vweird.f32 %v1256_v59  ;;  %v491_v42 = vand.u32 2147483647, %v1256_v59 }
 0x14d   : > { %v903_v48 = vpop.eup %902  ;;  %v317_v51 = vsub.f32 %v293_v44, %v302_v45 }
 0x14e   : > { %v393_v50 = vadd.f32 %v903_v48, %v901_v46  ;;  %v1263_v5 = vpop.eup %904  ;;  %v479_v46 = vor.u32 1.1754944e-38, %v478_v36  ;;  %v494_v49 = vor.u32 1.1754944e-38, %v493_v39  ;;  %vm492_vm0 = vcmp.eq.f32.partialorder %v491_v42, 8.507059e+37 }
 0x14f   : > { %v347_v56 = vmul.f32 1.442695, %v317_v51  ;;  %v468_v14 = vmul.f32 %v1263_v5, %v1254_v54  ;;  %vm473_vm6 = vweird.f32 %v1263_v5 }
 0x150   : > { %v394_v53 = vrot.slane %v393_v50, 4  ;;  %vm1300_vm10 = vmor %vm472_vm7, %vm473_vm6  ;;  %vm574_vm6 = vcmask 1044484  }
 0x151   : > { %906 = vpow2.f32 %v347_v56  ;;  %v469_v23 = vsub.f32 1.0, %v468_v14 }
 0x152   : > { %v395_v55 = vadd.f32 %v394_v53, %v393_v50  ;;  %v294_v57 = vpop.trf.xlu0 }
 0x153   : > { %v318_v58 = vsub.f32 %v294_v57, %v302_v45  ;;  %v470_v28 = vmul.f32 %v1263_v5, %v469_v23 }
 0x154   : > { %v396_v60 = vrot.slane %v395_v55, 2 }
 0x155   : > { %v349_v61 = vmul.f32 1.442695, %v318_v58  ;;  %v471_v35 = vadd.f32 %v1263_v5, %v470_v28 }
 0x156   : > { %v397_v63 = vadd.f32 %v396_v60, %v395_v55 }
 0x157   : > { %908 = vpow2.f32 %v349_v61  ;;  %v907_v8 = vpop.eup %906  ;;  %v475_v44 = vsel %vm1300_vm10, %v1263_v5, %v471_v35 }
 0x158   : > { %910 = vrcp.f32 %v1256_v59  ;;  %v398_v1 = vrot.slane %v397_v63, 1  ;;  %v480_v51 = vsel %vm477_vm15, %v479_v46, %v475_v44 }
 0x159   : > { %v757_v57 = vadd.f32 -1.0, %v480_v51  ;;  %v597_v62 = vmul.f32 %v480_v51, %v480_v51 }
 0x15a   : > { %v1261_v4 = vadd.f32 %v398_v1, %v397_v63 }
 0x15b   : > { %v556_v3 = vmul.f32 %v757_v57, %v757_v57 }
 0x15c   : > { %912 = vrcp.f32 %v1261_v4  ;;  %v508_v43 = vand.u32 2147483648, %v1261_v4  ;;  %vm502_vm13 = vweird.f32 %v1261_v4  ;;  %v506_v45 = vand.u32 2147483647, %v1261_v4 }
 0x15d   : > { %v909_v9 = vpop.eup %908 }
 0x15e   : > { %v911_v12 = vpop.eup %910  ;;  %v400_v13 = vadd.f32 %v909_v9, %v907_v8  ;;  %v509_v52 = vor.u32 1.1754944e-38, %v508_v43  ;;  %vm507_vm1 = vcmp.eq.f32.partialorder %v506_v45, 8.507059e+37  ;;  %v612_v8 = vsel %vm574_vm6, %v597_v62, %v1250_v32 }
 0x15f   : > { %v483_v17 = vmul.f32 %v911_v12, %v1256_v59  ;;  %vm488_vm8 = vweird.f32 %v911_v12  ;;  %v575_v32 = vsel %vm574_vm6, %v556_v3, %v1252_v34 }
 0x160   : > { %v401_v15 = vrot.slane %v400_v13, 4  ;;  %vm489_vm12 = vmor %vm487_vm11, %vm488_vm8  ;;  %vm1091_vm8 = vmmov 1   ;;  %vm576_vm11 = vcmask 1045509  }
 0x161   : > { %v484_v25 = vsub.f32 1.0, %v483_v17 }
 0x162   : > { %v913_v18 = vpop.eup %912  ;;  %v402_v19 = vadd.f32 %v401_v15, %v400_v13 }
 0x163   : > { %v498_v20 = vmul.f32 %v913_v18, %v1261_v4  ;;  %v485_v30 = vmul.f32 %v911_v12, %v484_v25  ;;  %vm503_vm9 = vweird.f32 %v913_v18 }
 0x164   : > { %v403_v24 = vrot.slane %v402_v19, 2  ;;  %vm504_vm14 = vmor %vm502_vm13, %vm503_vm9  ;;  %vm578_vm13 = vcmask 1046534  }
 0x165   : > { %v499_v26 = vsub.f32 1.0, %v498_v20  ;;  %v486_v37 = vadd.f32 %v911_v12, %v485_v30  ;;  %vm1315_vm9 = vmxor %vm528_vm3, %vm1091_vm8 }
 0x166   : > { %v404_v27 = vadd.f32 %v403_v24, %v402_v19  ;;  %vm542_vm3 = vmand %vm1315_vm9, %vm540_vm4 }
 0x167   : > { %v500_v31 = vmul.f32 %v913_v18, %v499_v26  ;;  %v490_v47 = vsel %vm489_vm12, %v911_v12, %v486_v37 }
 0x168   : > { %v405_v29 = vrot.slane %v404_v27, 1  ;;  %v495_v54 = vsel %vm492_vm0, %v494_v49, %v490_v47 }
 0x169   : > { %v501_v40 = vadd.f32 %v913_v18, %v500_v31  ;;  %v758_v59 = vadd.f32 -1.0, %v495_v54  ;;  %v598_v0 = vmul.f32 %v495_v54, %v495_v54 }
 0x16a   : > { %v406_v33 = vadd.f32 %v405_v29, %v404_v27 }
 0x16b   : > { %v505_v50 = vsel %vm504_vm14, %v913_v18, %v501_v40  ;;  %v557_v6 = vmul.f32 %v758_v59, %v758_v59  ;;  %vm580_vm14 = vcmask 1047559   ;;  %v613_v14 = vsel %vm576_vm11, %v598_v0, %v612_v8 }
 0x16c   : > { %914 = vrcp.f32 %v406_v33  ;;  %v510_v55 = vsel %vm507_vm1, %v509_v52, %v505_v50  ;;  %v523_v58 = vand.u32 2147483648, %v406_v33  ;;  %v521_v61 = vand.u32 2147483647, %v406_v33 }
 0x16d   : > { %v759_v63 = vadd.f32 -1.0, %v510_v55  ;;  %vm517_vm7 = vweird.f32 %v406_v33  ;;  %v599_v4 = vmul.f32 %v510_v55, %v510_v55  ;;  %v577_v18 = vsel %vm576_vm11, %v557_v6, %v575_v32 }
 0x16e   : > { %v524_v5 = vor.u32 1.1754944e-38, %v523_v58  ;;  %vm522_vm12 = vcmp.eq.f32.partialorder %v521_v61, 8.507059e+37 }
 0x16f   : > { %v558_v9 = vmul.f32 %v759_v63, %v759_v63  ;;  %v614_v15 = vsel %vm578_vm13, %v599_v4, %v613_v14 }
 0x171   : > { %v579_v11 = vsel %vm578_vm13, %v558_v9, %v577_v18 }
 0x172   : > { %v915_v48 = vpop.eup %914 }
 0x173   : > { %v513_v53 = vmul.f32 %v915_v48, %v406_v33  ;;  %vm518_vm2 = vweird.f32 %v915_v48 }
 0x174   : > { %vm519_vm10 = vmor %vm517_vm7, %vm518_vm2 }
 0x175   : > { %v514_v56 = vsub.f32 1.0, %v513_v53 }
 0x177   : > { %v515_v60 = vmul.f32 %v915_v48, %v514_v56 }
 0x179   : > { %v516_v1 = vadd.f32 %v915_v48, %v515_v60 }
 0x17b   : > { %v520_v7 = vsel %vm519_vm10, %v915_v48, %v516_v1 }
 0x17c   : > { %v525_v12 = vsel %vm522_vm12, %v524_v5, %v520_v7 }
 0x17d   : > { %v760_v10 = vadd.f32 -1.0, %v525_v12  ;;  %v600_v13 = vmul.f32 %v525_v12, %v525_v12 }
 0x17f   : > { %v559_v17 = vmul.f32 %v760_v10, %v760_v10  ;;  %v615_v19 = vsel %vm580_vm14, %v600_v13, %v614_v15 }
 0x180   : > { %v617_v20 = vsel %vm542_vm3, %v615_v19, 0.0 }
 0x181   : > { %v581_v21 = vsel %vm580_vm14, %v559_v17, %v579_v11  ;;  %764 = vst [vmem:[%s1290_s30 + $0x10] sm:$0xff] %v617_v20 }
 0x182   : > { %v583_v22 = vsel %vm1280_vm5, %v581_v21, 0.0 }
 0x183   : > { %585 = vst [vmem:[%s1290_s30] sm:$0xff] %v583_v22 }
 0x184   : > { %1003 = shalt.err (!%p1000_p4)
}
 0x185   : > { %s1092_s27 = smov 128   ;;  %s1093_s28 = smov 8  }
 0x186   : > { %775 = dma.vmem_to_hbm [thread:$0]  (%p1190_p1), %s634_s7, 384, %s636_s8, %s621_s12, %s1092_s27, %s1092_s27, %s1093_s28  }
 0x187 PF: > { %s650_s0 = sand.u32 1, %s1054_s9   ;;  %p785_p5 = pnand %p743_p2, %p1195_p3 }
 0x188   : > { %s651_s16 = scalar_lea.sflag [#allocation4], %s650_s0 }
 0x189   : > { %p786_p7 = pneg %p785_p5 }
 0x18b   : > { %1049 = dma.done.wait (%p786_p7), %s651_s16, 384  }
 0x18c   : > { %1051 = vsyncadd (%p786_p7), %s651_s16, 4294966912  ;;  %s21_s17 = sadd.s32 1, %s1086_s17   ;;  %s1404_s3 = sld [smem:[#allocation13_spill]] }
 0x18d   : > { %p18_p9 = scmp.ge.s32.totalorder %s21_s17, 4   ;;  %s1405_s15 = sld [smem:[#allocation11_spill]] }
 0x18e   : > { %s1406_s16 = sld [smem:[#allocation12_spill]]  ;;  %s1407_s9 = smov %s1058_s10 }
 0x18f   : > { %s1408_s10 = smov %s1062_s11  ;;  %s1409_s11 = smov %s1181_s29 }
 0x190   : > { %s1410_s12 = smov %s1070_s13  ;;  %s1411_s13 = smov %s1074_s14 }
 0x191   :  { %20 = sbr.rel (!%p18_p9) target bundleno = 12 (0xc), region = 92 }
 0x192   : > { %s1412_s14 = smov %s1404_s3 }
 0x196   :  { %657 = vsyncpa [#allocation3], 1 }
 0x197   :  { %659 = vsyncpa [#allocation3 + $0x1], 1 }
 0x198   :  { %660 = vsyncpa [#allocation6], 1 }
 0x199   :  { %662 = vsyncpa [#allocation6 + $0x1], 1 }
 0x19a   :  { %663 = vsyncpa [#allocation4], 1 }
 0x19b   :  { %665 = vsyncpa [#allocation4 + $0x1], 1 }

</bundles_post_ra>
